<compile_context>
chip_gen: v5e
topology: v5e:2x2
jax: 0.10.0
libtpu: 0.0.40
codegen_flags: <defaults>
</compile_context>

<pallas_src>
import jax
import jax.numpy as jnp
from jax.experimental import pallas as pl
from jax.experimental.pallas import tpu as pltpu

_LANE = 128         # hidden dims padded to a multiple of this (lane-dense weights)
_MAX_TB = 1024      # max batch tile; ~85% of HBM roofline.  Raise to 2048-4096 on v7x
                    # (set vmem_limit_bytes when sweeping above ~2048 on v5e).
_SPLIT_MIN_B = 256  # above this, force >=2 batch tiles so v7x megacore can shard them


def _round_up(n: int, m: int) -> int:
    return ((n + m - 1) // m) * m


def _pad2d(a, rows: int, cols: int):
    r, c = a.shape
    return jnp.pad(a, ((0, rows - r), (0, cols - c)))


def _mlp_kernel(x_ref, w1_ref, b1_ref, w2_ref, b2_ref, w3_ref, b3_ref, o_ref):
    # Fused hot path, all operands VMEM-resident (weights via constant index_map).
    # bf16 matmul operands (MXU-native), f32 accumulation; bias/ReLU in f32
    # (VPU-native on every generation, incl. v5e which has no bf16 VALUs).
    out_dim = o_ref.shape[-1]
    x = x_ref[...].astype(jnp.bfloat16)                     # (tb, d_in): cast in-register
    h1 = jnp.dot(x, w1_ref[...], preferred_element_type=jnp.float32)
    h1 = jnp.maximum(h1 + b1_ref[...], 0.0)
    h2 = jnp.dot(h1.astype(jnp.bfloat16), w2_ref[...],
                 preferred_element_type=jnp.float32)
    h2 = jnp.maximum(h2 + b2_ref[...], 0.0)
    y = jnp.dot(h2.astype(jnp.bfloat16), w3_ref[...],
                preferred_element_type=jnp.float32)
    # Store only the logical output lanes -> 16x smaller HBM write stream.
    o_ref[...] = (y[:, :out_dim] + b3_ref[...]).astype(o_ref.dtype)


def prepare_params(params):
    """One-time parameter prep (do NOT call per forward).

    Hidden/contract weight dims are zero-padded to multiples of 128 and cast to
    bf16; biases stay f32.  The input feature dim (K of the first matmul) is NOT
    padded -- the kernel consumes x as-is.  Padding is numerically free: padded
    weight rows multiply exact zeros and padded columns produce exact zeros that
    are sliced off before the final bias add.
    """
    w1, b1 = params["w1"], params["b1"]
    w2, b2 = params["w2"], params["b2"]
    w3, b3 = params["w3"], params["b3"]
    d_in, h1 = w1.shape
    _, h2 = w2.shape
    _, d_out = w3.shape
    h1p = _round_up(h1, _LANE)
    h2p = _round_up(h2, _LANE)
    op = _round_up(d_out, _LANE)
    return {
        "w1": _pad2d(w1, d_in, h1p).astype(jnp.bfloat16),   # K stays d_in (unpadded)
        "b1": _pad2d(b1, 1, h1p).astype(jnp.float32),
        "w2": _pad2d(w2, h1p, h2p).astype(jnp.bfloat16),
        "b2": _pad2d(b2, 1, h2p).astype(jnp.float32),
        "w3": _pad2d(w3, h2p, op).astype(jnp.bfloat16),     # N padded; kernel slices result
        "b3": b3.astype(jnp.float32),                       # (1, d_out): logical width
    }


def regressor_forward(x, p):
    """x: [B, d_in] f32 (unpadded); p: params from prepare_params. Returns [B, d_out] f32."""
    B, d_in = x.shape
    out_dim = p["b3"].shape[1]

    # Batch tiling: minimize padding; keep >=2 tiles for mid/large B (v7x megacore).
    nb = -(-B // _MAX_TB)
    if nb == 1 and B >= _SPLIT_MIN_B:
        nb = 2
    tb = -(-B // nb)
    tb = _round_up(tb, 16 if tb > 8 else 8)   # 16-row rounding matches bf16 sublane packing
    b_pad = nb * tb

    # Only pad rows (cheap, often a no-op); never pad/cast the feature dim.
    x_in = x if b_pad == B else jnp.pad(x, ((0, b_pad - B), (0, 0)))

    const = lambda a: pl.BlockSpec(a.shape, lambda i: (0, 0))   # DMA'd once, VMEM-resident

    out = pl.pallas_call(
        _mlp_kernel,
        out_shape=jax.ShapeDtypeStruct((b_pad, out_dim), jnp.float32),
        grid=(nb,),
        in_specs=[
            pl.BlockSpec((tb, d_in), lambda i: (i, 0)),   # x: streamed f32, unpadded feature dim
            const(p["w1"]), const(p["b1"]),
            const(p["w2"]), const(p["b2"]),
            const(p["w3"]), const(p["b3"]),
        ],
        # Logical output width -> no 16x write amplification, no wrapper lane-slice.
        out_specs=pl.BlockSpec((tb, out_dim), lambda i: (i, 0)),
        compiler_params=pltpu.CompilerParams(
            dimension_semantics=("parallel",),   # nb>=2 lets v7x split the batch over 2 TCs
        ),
    )(x_in, p["w1"], p["b1"], p["w2"], p["b2"], p["w3"], p["b3"])

    return out if b_pad == B else out[:B]


def init_linear(key, fan_in, fan_out):
    """Deterministic init mimicking torch.nn.Linear.reset_parameters
    (kaiming_uniform(a=sqrt(5)) -> U(-1/sqrt(fan_in), 1/sqrt(fan_in)))."""
    kw, kb = jax.random.split(key)
    bound = 1.0 / jnp.sqrt(jnp.float32(fan_in))
    w = jax.random.uniform(kw, (fan_in, fan_out), jnp.float32, -bound, bound)
    b = jax.random.uniform(kb, (1, fan_out), jnp.float32, -bound, bound)
    return w, b


if __name__ == "__main__":
    # Hyperparameters implied by the module's __init__ (args.*), small shapes:
    lstm_hidden_size = 16
    in_dim = lstm_hidden_size * 2 + 1          # 33
    regressor_hidden_size = 32
    regressor_hidden_size_2 = 32
    contract_size = 8
    batch = 8

    key = jax.random.PRNGKey(0)
    kx, k1, k2, k3 = jax.random.split(key, 4)

    x = jax.random.normal(kx, (batch, in_dim), jnp.float32)
    w1, b1 = init_linear(k1, in_dim, regressor_hidden_size)
    w2, b2 = init_linear(k2, regressor_hidden_size, regressor_hidden_size_2)
    w3, b3 = init_linear(k3, regressor_hidden_size_2, contract_size)
    params = dict(w1=w1, b1=b1, w2=w2, b2=b2, w3=w3, b3=b3)

    padded = prepare_params(params)

    out = regressor_forward(x, padded)
    out = jax.block_until_ready(out)
    assert out.shape == (batch, contract_size)

    # Reference 1: same bf16-operand / f32-accumulate math in plain JAX (tight tol).
    xb = x.astype(jnp.bfloat16)
    r1 = jnp.maximum(
        jnp.dot(xb, padded["w1"], preferred_element_type=jnp.float32) + padded["b1"], 0.0)
    r2 = jnp.maximum(
        jnp.dot(r1.astype(jnp.bfloat16), padded["w2"],
                preferred_element_type=jnp.float32) + padded["b2"], 0.0)
    ref_bf16 = (jnp.dot(r2.astype(jnp.bfloat16), padded["w3"],
                        preferred_element_type=jnp.float32)[:, :contract_size]
                + padded["b3"])
    assert jnp.allclose(out, ref_bf16, atol=2e-3, rtol=2e-3), "bf16 reference mismatch"

    # Reference 2: original f32 module semantics (loose tol: bf16 matmul operands).
    h1 = jnp.maximum(x @ w1 + b1, 0.0)
    h2 = jnp.maximum(h1 @ w2 + b2, 0.0)
    ref_f32 = h2 @ w3 + b3
    assert jnp.allclose(out, ref_f32, atol=5e-2, rtol=5e-2), "f32 reference mismatch"

    print("KERNEL_OK")
</pallas_src>

<mosaic_0001>
module attributes {stable_mosaic.version = 11 : i64} {
  func.func @_mlp_kernel(%arg0: i32, %arg1: memref<8x33xf32, #tpu.memory_space<vmem>>, %arg2: memref<33x128xbf16, #tpu.memory_space<vmem>>, %arg3: memref<1x128xf32, #tpu.memory_space<vmem>>, %arg4: memref<128x128xbf16, #tpu.memory_space<vmem>>, %arg5: memref<1x128xf32, #tpu.memory_space<vmem>>, %arg6: memref<128x128xbf16, #tpu.memory_space<vmem>>, %arg7: memref<1x8xf32, #tpu.memory_space<vmem>>, %arg8: memref<8x8xf32, #tpu.memory_space<vmem>>) attributes {dimension_semantics = [#tpu.dimension_semantics<parallel>], iteration_bounds = array<i64: 1>, scalar_prefetch = 0 : i64, scratch_operands = 0 : i64, tpu.core_type = #tpu.core_type<tc>, window_params = [{transform_indices = @transform_0, window_bounds = array<i64: 8, 33>}, {pipeline_mode = #tpu.pipeline_mode<synchronous>, transform_indices = @transform_1, window_bounds = array<i64: 33, 128>}, {pipeline_mode = #tpu.pipeline_mode<synchronous>, transform_indices = @transform_2, window_bounds = array<i64: 1, 128>}, {pipeline_mode = #tpu.pipeline_mode<synchronous>, transform_indices = @transform_3, window_bounds = array<i64: 128, 128>}, {pipeline_mode = #tpu.pipeline_mode<synchronous>, transform_indices = @transform_4, window_bounds = array<i64: 1, 128>}, {pipeline_mode = #tpu.pipeline_mode<synchronous>, transform_indices = @transform_5, window_bounds = array<i64: 128, 128>}, {pipeline_mode = #tpu.pipeline_mode<synchronous>, transform_indices = @transform_6, window_bounds = array<i64: 1, 8>}, {transform_indices = @transform_7, window_bounds = array<i64: 8, 8>}]} {
    %c0 = arith.constant 0 : index
    %c0_0 = arith.constant 0 : index
    %0 = vector.load %arg1[%c0, %c0_0] : memref<8x33xf32, #tpu.memory_space<vmem>>, vector<8x33xf32>
    %1 = arith.truncf %0 : vector<8x33xf32> to vector<8x33xbf16>
    %c0_1 = arith.constant 0 : index
    %c0_2 = arith.constant 0 : index
    %2 = vector.load %arg2[%c0_1, %c0_2] : memref<33x128xbf16, #tpu.memory_space<vmem>>, vector<33x128xbf16>
    %cst = arith.constant dense<0.000000e+00> : vector<8x128xf32>
    %3 = tpu.matmul %1, %2, %cst {dimension_numbers = #tpu.dot_dimension_numbers<[1], [0], [0], [1], [0, 0, 1, 1], [], []>} : vector<8x33xbf16>, vector<33x128xbf16>, vector<8x128xf32> -> vector<8x128xf32>
    %c0_3 = arith.constant 0 : index
    %c0_4 = arith.constant 0 : index
    %4 = vector.load %arg3[%c0_3, %c0_4] : memref<1x128xf32, #tpu.memory_space<vmem>>, vector<1x128xf32>
    %5 = vector.broadcast %4 : vector<1x128xf32> to vector<8x128xf32>
    %6 = arith.addf %3, %5 : vector<8x128xf32>
    %cst_5 = arith.constant 0.000000e+00 : f32
    %7 = vector.broadcast %cst_5 : f32 to vector<8x128xf32>
    %8 = arith.maximumf %6, %7 : vector<8x128xf32>
    %9 = arith.truncf %8 : vector<8x128xf32> to vector<8x128xbf16>
    %c0_6 = arith.constant 0 : index
    %c0_7 = arith.constant 0 : index
    %10 = vector.load %arg4[%c0_6, %c0_7] : memref<128x128xbf16, #tpu.memory_space<vmem>>, vector<128x128xbf16>
    %cst_8 = arith.constant dense<0.000000e+00> : vector<8x128xf32>
    %11 = tpu.matmul %9, %10, %cst_8 {dimension_numbers = #tpu.dot_dimension_numbers<[1], [0], [0], [1], [0, 0, 1, 1], [], []>} : vector<8x128xbf16>, vector<128x128xbf16>, vector<8x128xf32> -> vector<8x128xf32>
    %c0_9 = arith.constant 0 : index
    %c0_10 = arith.constant 0 : index
    %12 = vector.load %arg5[%c0_9, %c0_10] : memref<1x128xf32, #tpu.memory_space<vmem>>, vector<1x128xf32>
    %13 = vector.broadcast %12 : vector<1x128xf32> to vector<8x128xf32>
    %14 = arith.addf %11, %13 : vector<8x128xf32>
    %cst_11 = arith.constant 0.000000e+00 : f32
    %15 = vector.broadcast %cst_11 : f32 to vector<8x128xf32>
    %16 = arith.maximumf %14, %15 : vector<8x128xf32>
    %17 = arith.truncf %16 : vector<8x128xf32> to vector<8x128xbf16>
    %c0_12 = arith.constant 0 : index
    %c0_13 = arith.constant 0 : index
    %18 = vector.load %arg6[%c0_12, %c0_13] : memref<128x128xbf16, #tpu.memory_space<vmem>>, vector<128x128xbf16>
    %cst_14 = arith.constant dense<0.000000e+00> : vector<8x128xf32>
    %19 = tpu.matmul %17, %18, %cst_14 {dimension_numbers = #tpu.dot_dimension_numbers<[1], [0], [0], [1], [0, 0, 1, 1], [], []>} : vector<8x128xbf16>, vector<128x128xbf16>, vector<8x128xf32> -> vector<8x128xf32>
    %20 = vector.extract_strided_slice %19 {offsets = [0, 0], sizes = [8, 8], strides = [1, 1]} : vector<8x128xf32> to vector<8x8xf32>
    %c0_15 = arith.constant 0 : index
    %c0_16 = arith.constant 0 : index
    %21 = vector.load %arg7[%c0_15, %c0_16] : memref<1x8xf32, #tpu.memory_space<vmem>>, vector<1x8xf32>
    %22 = vector.broadcast %21 : vector<1x8xf32> to vector<8x8xf32>
    %23 = arith.addf %20, %22 : vector<8x8xf32>
    %c0_17 = arith.constant 0 : index
    %c0_18 = arith.constant 0 : index
    %24 = vector.load %arg8[%c0_17, %c0_18] : memref<8x8xf32, #tpu.memory_space<vmem>>, vector<8x8xf32>
    tpu.vector_store %arg8[%c0_17, %c0_18], %23 {strides = array<i32>} : memref<8x8xf32, #tpu.memory_space<vmem>>, vector<8x8xf32>,
    return
  }
  func.func @transform_0(%arg0: i32) -> (i32, i32) {
    %c0_i32 = arith.constant 0 : i32
    %c0_i32_0 = arith.constant 0 : i32
    return %arg0, %c0_i32 : i32, i32
  }
  func.func @transform_1(%arg0: i32) -> (i32, i32) {
    %c0_i32 = arith.constant 0 : i32
    %c0_i32_0 = arith.constant 0 : i32
    %c0_i32_1 = arith.constant 0 : i32
    return %c0_i32, %c0_i32_0 : i32, i32
  }
  func.func @transform_2(%arg0: i32) -> (i32, i32) {
    %c0_i32 = arith.constant 0 : i32
    %c0_i32_0 = arith.constant 0 : i32
    %c0_i32_1 = arith.constant 0 : i32
    return %c0_i32, %c0_i32_0 : i32, i32
  }
  func.func @transform_3(%arg0: i32) -> (i32, i32) {
    %c0_i32 = arith.constant 0 : i32
    %c0_i32_0 = arith.constant 0 : i32
    %c0_i32_1 = arith.constant 0 : i32
    return %c0_i32, %c0_i32_0 : i32, i32
  }
  func.func @transform_4(%arg0: i32) -> (i32, i32) {
    %c0_i32 = arith.constant 0 : i32
    %c0_i32_0 = arith.constant 0 : i32
    %c0_i32_1 = arith.constant 0 : i32
    return %c0_i32, %c0_i32_0 : i32, i32
  }
  func.func @transform_5(%arg0: i32) -> (i32, i32) {
    %c0_i32 = arith.constant 0 : i32
    %c0_i32_0 = arith.constant 0 : i32
    %c0_i32_1 = arith.constant 0 : i32
    return %c0_i32, %c0_i32_0 : i32, i32
  }
  func.func @transform_6(%arg0: i32) -> (i32, i32) {
    %c0_i32 = arith.constant 0 : i32
    %c0_i32_0 = arith.constant 0 : i32
    %c0_i32_1 = arith.constant 0 : i32
    return %c0_i32, %c0_i32_0 : i32, i32
  }
  func.func @transform_7(%arg0: i32) -> (i32, i32) {
    %c0_i32 = arith.constant 0 : i32
    %c0_i32_0 = arith.constant 0 : i32
    return %arg0, %c0_i32 : i32, i32
  }
}

</mosaic_0001>

<bundles_post_ra>
// kernel: tpu_custom_call.1
= control target key start
LH: loop header
LB: loop body
LE: loop exit
PB: predicated region body
PF: predicated region fallthrough
CT: control target
= control target key end

     0   :  { %12 = vsyncpa [#allocation3], 0  ;;  %s628_s0 = inlined_call_operand.hbm [shape: f32[8,33], index: 0, kind: input, shape index: {}]   ;;  %s629_s1 = inlined_call_operand.hbm [shape: bf16[33,128], index: 1, kind: input, shape index: {}]   ;;  %s630_s2 = inlined_call_operand.vmem [shape: f32[1,128], index: 2, kind: input, shape index: {}]   ;;  %s631_s3 = inlined_call_operand.hbm [shape: bf16[128,128], index: 3, kind: input, shape index: {}]   ;;  %s632_s4 = inlined_call_operand.vmem [shape: f32[1,128], index: 4, kind: input, shape index: {}]   ;;  %s633_s5 = inlined_call_operand.hbm [shape: bf16[128,128], index: 5, kind: input, shape index: {}]   ;;  %s634_s6 = inlined_call_operand.vmem [shape: f32[1,8], index: 6, kind: input, shape index: {}]   ;;  %s635_s7 = inlined_call_operand.hbm [shape: f32[8,8], index: 7, kind: output, shape index: {}]  }
   0x1   :  { %13 = vsyncpa [#allocation6], 0 }
   0x2   :  { %14 = vsyncpa [#allocation9], 0  ;;  %s31_s26 = sshll.u32 %s629_s1, 4  ;;  %s32_s26 = int_to_ptr.hbm [resolvable:$true] %s31_s26 }
   0x3   :  { %15 = vsyncpa [#allocation4], 0  ;;  %s556_s27 = smov [#allocation5]   ;;  %s21_s8 = sshll.u32 %s628_s0, 4  ;;  %s22_s8 = int_to_ptr.hbm [resolvable:$true] %s21_s8 }
   0x4   :  { %s33_s28 = sshll.u32 %s556_s27, 4  ;;  %s557_s9 = smov 64   ;;  %s34_s28 = int_to_ptr.vmem [resolvable:$true] %s33_s28 }
   0x5   :  { %s558_s10 = smov 4   ;;  %s559_s11 = smov [#allocation2]  }
   0x6   :  { %39 = dma.hbm_to_vmem [thread:$0]  %s32_s26, 320, %s34_s28, [#allocation6], %s557_s9, %s557_s9, %s558_s10  }
   0x7   :  { %s23_s12 = sshll.u32 %s559_s11, 4  ;;  %s46_s15 = sshll.u32 %s631_s3, 4  ;;  %s24_s12 = int_to_ptr.vmem [resolvable:$true] %s23_s12  ;;  %s47_s15 = int_to_ptr.hbm [resolvable:$true] %s46_s15 }
   0x8   :  { %26 = dma.hbm_to_vmem [thread:$0]  %s22_s8, 128, %s24_s12, [#allocation3]  }
   0x9   :  { %s61_s17 = sshll.u32 %s633_s5, 4  ;;  %s560_s18 = smov [#allocation7]   ;;  %s62_s17 = int_to_ptr.hbm [resolvable:$true] %s61_s17 }
   0xa   :  { %s48_s19 = sshll.u32 %s560_s18, 4  ;;  %s561_s0 = smov [#allocation8]   ;;  %s49_s19 = int_to_ptr.vmem [resolvable:$true] %s48_s19 }
   0xb   :  { %54 = dma.hbm_to_vmem [thread:$0]  %s47_s15, 1024, %s49_s19, [#allocation6], %s557_s9, %s557_s9, %s558_s10  }
   0xc   :  { %s63_s20 = sshll.u32 %s561_s0, 4  ;;  %s64_s20 = int_to_ptr.vmem [resolvable:$true] %s63_s20 }
   0xd   :  { %69 = dma.hbm_to_vmem [thread:$0]  %s62_s17, 1024, %s64_s20, [#allocation9], %s557_s9, %s557_s9, %s558_s10  }
   0xe   :  { %548 = dma.done.wait [#allocation3], 128  }
   0xf   :  { %549 = vsyncadd [#allocation3], 4294967168 }
  0x10   :  { %550 = dma.done.wait [#allocation6], 1344  }
  0x11   :  { %551 = vsyncadd [#allocation6], 4294965952 }
  0x12   :  { %552 = dma.done.wait [#allocation9], 1024  }
  0x13   :  { %553 = vsyncadd [#allocation9], 4294966272  ;;  %vm119_vm0 = vcmask 1040384   ;;  %v95_v0 = vld [vmem:[#allocation5 + $0x10] sm:$0x1]  ;;  %v562_v3 = vmov 0  }
  0x14   :  { %v109_v1 = vunpack.c.l.b16 %v95_v0  ;;  %v408_v2 = vld [vmem:[#allocation7 + $0x38] sm:$0xff]  ;;  %v121_v4 = vsel %vm119_vm0, 65535, %v562_v3  ;;  %v407_v6 = vld [vmem:[#allocation7 + $0x30] sm:$0xff]  ;;  %v406_v9 = vld [vmem:[#allocation7 + $0x28] sm:$0xff]  ;;  %vm115_vm1 = vcmask 269312   ;;  %s563_s24 = smov [#allocation10]  }
  0x15   :  { %208 = vmatpush.bf16.msra.mxu1 %v408_v2  ;;  %v400_v8 = vld [vmem:[#allocation5 + $0x8] sm:$0xff]  ;;  %v399_v10 = vld [vmem:[#allocation5] sm:$0xff]  ;;  %v89_v11 = vld [vmem:[#allocation2] sm:$0xff]  ;;  %s312_s25 = sshll.u32 %s563_s24, 4  ;;  %s314_s28 = sshll.u32 %s635_s7, 4  ;;  %vm305_vm2 = vcmask 64512   ;;  %s313_s25 = int_to_ptr.vmem [resolvable:$true] %s312_s25  ;;  %s315_s28 = int_to_ptr.hbm [resolvable:$true] %s314_s28 }
  0x16   :  { %v112_v5 = vpack.c.b16 %v109_v1, %v109_v1  ;;  %v405_v12 = vld [vmem:[#allocation7 + $0x20] sm:$0xff]  ;;  %v90_v13 = vpack.c.bf16 %v89_v11, %v89_v11  ;;  %v404_v14 = vld [vmem:[#allocation7 + $0x18] sm:$0xff]  ;;  %v403_v15 = vld [vmem:[#allocation7 + $0x10] sm:$0xff] }
  0x17   :  { %v402_v16 = vld [vmem:[#allocation7 + $0x8] sm:$0xff]  ;;  %v401_v17 = vld [vmem:[#allocation7] sm:$0xff]  ;;  %v416_v18 = vld [vmem:[#allocation8 + $0x38] sm:$0xff] }
  0x18   :  { %v123_v7 = vand.u32 %v121_v4, %v112_v5  ;;  %287 = vmatpush.bf16.msra.mxu2 %v416_v18  ;;  %v415_v19 = vld [vmem:[#allocation8 + $0x30] sm:$0xff]  ;;  %v414_v20 = vld [vmem:[#allocation8 + $0x28] sm:$0xff]  ;;  %v413_v21 = vld [vmem:[#allocation8 + $0x20] sm:$0xff] }
  0x19   :  { %209 = vmatpush.bf16.msra.mxu1 %v407_v6  ;;  %v412_v22 = vld [vmem:[#allocation8 + $0x18] sm:$0xff]  ;;  %v411_v23 = vld [vmem:[#allocation8 + $0x10] sm:$0xff]  ;;  %v425_v24 = vld [vmem:[%s630_s2] ss:$0 sm:$0xff] }
  0x1a   :  { %130 = vmatpush.bf16.msra.mxu0 %v123_v7  ;;  %v410_v30 = vld [vmem:[#allocation8 + $0x8] sm:$0xff]  ;;  %v409_v31 = vld [vmem:[#allocation8] sm:$0xff] }
  0x1b   :  { %v426_v32 = vld [vmem:[%s632_s4] ss:$0 sm:$0xff] }
  0x1c   :  { %288 = vmatpush.bf16.msra.mxu2 %v415_v19  ;;  %v427_v38 = vld [vmem:[%s634_s6] ss:$0 sm:$0xff] }
  0x1d   :  { %210 = vmatpush.bf16.msra.mxu1 %v406_v9 }
  0x1e   :  { %131 = vmatpush.bf16.msra.mxu0 %v400_v8 }
  0x20   :  { %289 = vmatpush.bf16.msra.mxu2 %v414_v20 }
  0x21   :  { %211 = vmatpush.bf16.msra.mxu1 %v405_v12 }
  0x22   :  { %132 = vmatpush.bf16.msra.mxu0 %v399_v10 }
  0x24   :  { %290 = vmatpush.bf16.msra.mxu2 %v413_v21 }
  0x25   :  { %334 = vmatmul.msk.bf16.vlgmr.msra.gmra.mxu0 %vm115_vm1, %v90_v13  ;;  %212 = vmatpush.bf16.msra.mxu1 %v404_v14 }
  0x28   :  { %291 = vmatpush.bf16.msra.mxu2 %v412_v22 }
  0x29   :  { %213 = vmatpush.bf16.msra.mxu1 %v403_v15 }
  0x2c   :  { %292 = vmatpush.bf16.msra.mxu2 %v411_v23 }
  0x2d   :  { %214 = vmatpush.bf16.msra.mxu1 %v402_v16 }
  0x30   :  { %293 = vmatpush.bf16.msra.mxu2 %v410_v30 }
  0x31   :  { %215 = vmatpush.bf16.msra.mxu1 %v401_v17 }
  0x34   :  { %294 = vmatpush.bf16.msra.mxu2 %v409_v31 }
  0xa2   :  { %v134_v25 = vpop.f32.mrf.mxu0 }
  0xa3   :  { %v135_v26 = vadd.f32 %v425_v24, %v134_v25 }
  0xa5   :  { %v138_v27 = vmax.f32 %v135_v26, 0.0 }
  0xa7   :  { %v139_v28 = vpack.c.bf16 %v138_v27, %v138_v27 }
  0xa9   :  { %216 = vmatmul.bf16.vlgmr.msra.gmra.mxu1 %v139_v28 }
  0xaa   :  { %v136_v29 = vpop.f32.mrf.mxu0 }
 0x126   :  { %v217_v33 = vpop.f32.mrf.mxu1 }
 0x127   :  { %v218_v34 = vadd.f32 %v426_v32, %v217_v33 }
 0x129   :  { %v221_v35 = vmax.f32 %v218_v34, 0.0 }
 0x12b   :  { %v222_v36 = vpack.c.bf16 %v221_v35, %v221_v35 }
 0x12d   :  { %295 = vmatmul.bf16.vlgmr.msra.gmra.mxu2 %v222_v36 }
 0x12e   :  { %v219_v37 = vpop.f32.mrf.mxu1 }
 0x1b0   :  { %v296_v39 = vpop.f32.mrf.mxu2 }
 0x1b1   :  { %v304_v40 = vadd.f32 %v427_v38, %v296_v39 }
 0x1b3   :  { %306 = vst.msk [vmem:[#allocation10] sm:$0xff] %vm305_vm2, %v304_v40 }
 0x1b4   :  { %317 = dma.vmem_to_hbm [thread:$0]  %s313_s25, 128, %s315_s28, [#allocation4]  }
 0x1b8   :  { %v298_v41 = vpop.f32.mrf.mxu2 }
 0x1b9   :  { %554 = dma.done.wait [#allocation4], 128  }
 0x1ba   :  { %555 = vsyncadd [#allocation4], 4294967168 }
 0x1bb   :  { %322 = vsyncpa [#allocation3], 1 }
 0x1bc   :  { %323 = vsyncpa [#allocation6], 1 }
 0x1bd   :  { %324 = vsyncpa [#allocation9], 1 }
 0x1be   :  { %325 = vsyncpa [#allocation4], 1 }

</bundles_post_ra>
